<compile_context>
chip_gen: v7x
topology: tpu7x:2x2x1
jax: 0.10.0
libtpu: 0.0.40
codegen_flags: <defaults>
</compile_context>

<pallas_src>
import math

import jax
import jax.numpy as jnp
from jax.experimental import pallas as pl
from jax.experimental.pallas import tpu as pltpu

EPS = 1e-5
_INV_SQRT2 = 1.0 / math.sqrt(2.0)


def _be_kernel(x_ref, u_ref, vb_ref, w1_ref, b1_ref, w2_ref, b2_ref,
               o_ref, acc_ref, xn_ref):
    """One grid step: n_tile batch elements x one k_tile chunk of U.

    Grid = (batch_tiles, k_tiles); axis 1 is the contraction (reduction) axis
    of the per-batch matmul and is iterated innermost ("arbitrary")."""
    k = pl.program_id(1)
    nk = pl.num_programs(1)
    tk = u_ref.shape[1]                      # static k-chunk size

    @pl.when(k == 0)
    def _():
        # LayerNorm1 over vocab_dim (biased variance, eps=1e-5, affine),
        # computed once per batch tile and kept resident in VMEM scratch for
        # both the per-k contraction slices and the residual ("skip" in the
        # module is the post-LN1 activation).
        x = x_ref[...]                       # (NT, B, V) f32
        mu1 = jnp.mean(x, axis=-1, keepdims=True)
        var1 = jnp.mean(jnp.square(x - mu1), axis=-1, keepdims=True)
        xn_ref[...] = (x - mu1) * jax.lax.rsqrt(var1 + EPS) * w1_ref[...] + b1_ref[...]
        acc_ref[...] = jnp.zeros_like(acc_ref)

    # dense_baens: per-batch-element matmul, bf16 MXU inputs, f32 accumulation.
    u = u_ref[...]                           # (NT, TK, V) bf16
    if tk == xn_ref.shape[-1]:
        xk = xn_ref[...]                     # untiled contraction (common case)
    else:
        off = pl.multiple_of(k * tk, tk)     # lane-aligned dynamic slice
        xk = xn_ref[:, :, pl.ds(off, tk)]
    acc_ref[...] += jnp.einsum("nbk,nke->nbe", xk.astype(u.dtype), u,
                               preferred_element_type=jnp.float32)

    @pl.when(k == nk - 1)
    def _():
        act = acc_ref[...] + vb_ref[...]     # per-batch bias (V_map.bias)
        # LayerNorm2 over vocab_dim.
        mu2 = jnp.mean(act, axis=-1, keepdims=True)
        var2 = jnp.mean(jnp.square(act - mu2), axis=-1, keepdims=True)
        an = (act - mu2) * jax.lax.rsqrt(var2 + EPS) * w2_ref[...] + b2_ref[...]
        # Exact (erf-based) GELU, matching torch.nn.functional.gelu's default.
        g = 0.5 * an * (1.0 + jax.lax.erf(an * _INV_SQRT2))
        o_ref[...] = (xn_ref[...] + g) * 0.5
        # TODO(synk): for vocab_dim < 128 a lane-dense (NT, B*V) store would
        # avoid masked vst.msk partial stores; the (B, V) -> (B*V) in-kernel
        # relayout is skipped for lowering robustness (irrelevant when
        # vocab_dim % 128 == 0).


# ---------------------------------------------------------------------------
# Tiling / VMEM policy (generation-aware).
# ---------------------------------------------------------------------------
def _tpu_budget():
    """Return (per-core VMEM bytes, likely-multi-TensorCore?) with safe fallbacks."""
    vmem = 64 * 1024 * 1024          # conservative default: v7x per-core VMEM
    multi_tc = True                  # conservative: assume 2 TCs split the batch axis
    try:
        info = pltpu.get_tpu_info()
        vmem = int(info.vmem_capacity_bytes)
        # v5e / v6e expose 128 MiB to their single TensorCore; v7x exposes
        # 64 MiB per core and has 2 TensorCores per chip.
        multi_tc = vmem < (100 * 1024 * 1024)
    except Exception:
        pass
    return vmem, multi_tc


def _pick_k_tile(vocab_dim, tk_cap):
    """Largest divisor of vocab_dim <= tk_cap, preferring lane-aligned (x128)
    then sublane-aligned (x8) chunks (BlockSpec second-minor constraint)."""
    divs = [d for d in range(1, vocab_dim + 1) if vocab_dim % d == 0]
    fit = [d for d in divs if d <= max(1, tk_cap)]
    for pref in (128, 8):
        aligned = [d for d in fit if d % pref == 0]
        if aligned:
            return max(aligned)
    # No aligned divisor fits: fall back to the full dim (always legal);
    # only hit for pathological vocab_dims.
    return vocab_dim


def _pick_tiles(batch_size, branch, vocab_dim):
    """Choose (n_tile, k_tile).  The (per-core) VMEM budget for the
    double-buffered bf16 U stream is the BINDING constraint."""
    vmem, multi_tc = _tpu_budget()
    budget = int(0.6 * vmem)                 # bytes for double-buffered U
    u_full = vocab_dim * vocab_dim * 2       # one (V, V) bf16 matrix

    if 2 * u_full <= budget:
        # Untiled (V, V) U blocks; fold as many batch elements per step as the
        # VMEM budget allows (bigger blocks amortise the ~0.35 us per-step
        # cost and DMA ramp -> closer to HBM roofline).
        k_tile = vocab_dim
        cap = max(1, budget // (2 * u_full))
        cands = [d for d in range(1, batch_size + 1)
                 if batch_size % d == 0 and d <= cap]
        if multi_tc and batch_size >= 4:
            # 2-TC chip: keep >= 4 grid steps (preferably even) so each core
            # gets >= 2 pipelined steps on the "parallel" batch axis.
            even = [d for d in cands
                    if batch_size // d >= 4 and (batch_size // d) % 2 == 0]
            four = [d for d in cands if batch_size // d >= 4]
            cands = even or four or cands
        n_tile = max(cands)
    else:
        # vocab_dim too large to double-buffer a full (V, V) bf16 U block
        # (e.g. V >~ 3k on v7x's 64 MiB/core): K-tile the contraction dim.
        n_tile = 1
        tk_cap = budget // (2 * vocab_dim * 2)
        k_tile = _pick_k_tile(vocab_dim, tk_cap)
    return n_tile, k_tile


# ---------------------------------------------------------------------------
# Forward wrapper.
# ---------------------------------------------------------------------------
def be_layer_forward(x, params, *, branch, vocab_dim, batch_size,
                     n_tile=None, k_tile=None):
    """x: any array reshapeable to (batch_size, branch, vocab_dim)."""
    U, Vb, w1, b1, w2, b2 = params
    x = x.reshape(batch_size, branch, vocab_dim)
    if x.dtype != jnp.float32:
        x = x.astype(jnp.float32)

    # U should already be stored in bf16 (cast once at init / load time); the
    # astype below is a no-op in that case, so the dominant HBM stream is not
    # re-materialised by a per-call convert op.
    U_bf16 = U if U.dtype == jnp.bfloat16 else U.astype(jnp.bfloat16)
    # TODO(synk): int8 U (v5e/v6e MXU) or fp8-e4m3 U (v7x MXU) with per-row
    # scales would halve the dominant stream again; needs accuracy sign-off.
    Vb_f32 = Vb.astype(jnp.float32)

    # 2-D views of LN params so they map cleanly onto (sublane, lane).
    w1_2d = w1.reshape(1, vocab_dim).astype(jnp.float32)
    b1_2d = b1.reshape(1, vocab_dim).astype(jnp.float32)
    w2_2d = w2.reshape(1, vocab_dim).astype(jnp.float32)
    b2_2d = b2.reshape(1, vocab_dim).astype(jnp.float32)

    auto_n, auto_k = _pick_tiles(batch_size, branch, vocab_dim)
    n_tile = auto_n if n_tile is None else n_tile
    k_tile = auto_k if k_tile is None else k_tile
    assert batch_size % n_tile == 0, (batch_size, n_tile)
    assert vocab_dim % k_tile == 0, (vocab_dim, k_tile)
    grid = (batch_size // n_tile, vocab_dim // k_tile)

    # vmem_limit derived from actual block sizes (double-buffered pipeline
    # buffers + scratch), clamped under the physical per-core capacity.
    vmem, _ = _tpu_budget()
    bv_block = n_tile * branch * vocab_dim * 4
    need = (2 * (n_tile * k_tile * vocab_dim * 2      # U (double-buffered)
                 + 3 * bv_block)                      # x, Vb, out buffers
            + 2 * bv_block                            # acc + xn scratch
            + 4 * vocab_dim * 4)                      # LN params
    vmem_limit = min(int(0.88 * vmem),
                     max(32 * 1024 * 1024, need + (8 << 20)))

    out = pl.pallas_call(
        _be_kernel,
        out_shape=jax.ShapeDtypeStruct((batch_size, branch, vocab_dim), jnp.float32),
        grid_spec=pltpu.PrefetchScalarGridSpec(
            num_scalar_prefetch=0,
            grid=grid,
            in_specs=[
                pl.BlockSpec((n_tile, branch, vocab_dim), lambda n, k: (n, 0, 0)),   # x
                pl.BlockSpec((n_tile, k_tile, vocab_dim), lambda n, k: (n, k, 0)),   # U (bf16)
                pl.BlockSpec((n_tile, branch, vocab_dim), lambda n, k: (n, 0, 0)),   # V_map bias
                pl.BlockSpec((1, vocab_dim), lambda n, k: (0, 0)),                   # ln1 weight
                pl.BlockSpec((1, vocab_dim), lambda n, k: (0, 0)),                   # ln1 bias
                pl.BlockSpec((1, vocab_dim), lambda n, k: (0, 0)),                   # ln2 weight
                pl.BlockSpec((1, vocab_dim), lambda n, k: (0, 0)),                   # ln2 bias
            ],
            out_specs=pl.BlockSpec((n_tile, branch, vocab_dim), lambda n, k: (n, 0, 0)),
            scratch_shapes=[
                pltpu.VMEM((n_tile, branch, vocab_dim), jnp.float32),   # f32 accumulator
                pltpu.VMEM((n_tile, branch, vocab_dim), jnp.float32),   # LN1 output / skip
            ],
        ),
        compiler_params=pltpu.CompilerParams(
            dimension_semantics=("parallel", "arbitrary"),
            vmem_limit_bytes=vmem_limit,
        ),
    )(x, U_bf16, Vb_f32, w1_2d, b1_2d, w2_2d, b2_2d)

    # Metadata-only reshape (contiguous row-major), matching the module output.
    return out.reshape(batch_size, 1, branch * vocab_dim)


# ---------------------------------------------------------------------------
# Params / reference.
# ---------------------------------------------------------------------------
def init_params(key, *, branch, vocab_dim, batch_size):
    kU, kB = jax.random.split(key)
    # torch.normal(0, 0.01, ...) equivalents.  U is cast to bf16 ONCE here so
    # every forward streams it directly (no per-call convert op over U).
    U = (0.01 * jax.random.normal(kU, (batch_size, vocab_dim, vocab_dim),
                                  jnp.float32)).astype(jnp.bfloat16)
    Vb = 0.01 * jax.random.normal(kB, (batch_size, branch, vocab_dim), jnp.float32)
    # LayerNorm(elementwise_affine=True) default init: weight=1, bias=0.
    w1 = jnp.ones((vocab_dim,), jnp.float32)
    b1 = jnp.zeros((vocab_dim,), jnp.float32)
    w2 = jnp.ones((vocab_dim,), jnp.float32)
    b2 = jnp.zeros((vocab_dim,), jnp.float32)
    return (U, Vb, w1, b1, w2, b2)


def _ln(v, w, b):
    mu = jnp.mean(v, axis=-1, keepdims=True)
    var = jnp.mean(jnp.square(v - mu), axis=-1, keepdims=True)
    return (v - mu) * jax.lax.rsqrt(var + EPS) * w + b


def _reference(x, params, *, branch, vocab_dim, batch_size, bf16_matmul=False):
    """Pure-JAX reference mirroring the PyTorch forward.

    bf16_matmul=True emulates the kernel's precision (bf16 MXU inputs,
    f32 accumulation) so it can be compared with a tight tolerance."""
    U, Vb, w1, b1, w2, b2 = params
    x = x.reshape(batch_size, branch, vocab_dim).astype(jnp.float32)
    xn = _ln(x, w1, b1)
    skip = xn
    if bf16_matmul:
        act = jnp.einsum("nbd,nde->nbe", xn.astype(jnp.bfloat16),
                         U.astype(jnp.bfloat16),
                         preferred_element_type=jnp.float32) + Vb
    else:
        act = jnp.einsum("nbd,nde->nbe", xn, U.astype(jnp.float32)) + Vb
    an = _ln(act, w2, b2)
    g = 0.5 * an * (1.0 + jax.lax.erf(an * _INV_SQRT2))
    out = (skip + g) * 0.5
    return out.reshape(batch_size, 1, branch * vocab_dim)


if __name__ == "__main__":
    # --- Test 1: small, module-consistent shapes (untiled contraction). ---
    batch_size = 2   # N (ensemble / batch of dense_baens)
    branch = 4       # B
    vocab_dim = 32   # D1 == D2
    ffn_dim = 64     # unused in forward (kept for parity with the module)

    key = jax.random.PRNGKey(0)
    kx, kp = jax.random.split(key)
    x = jax.random.normal(kx, (batch_size, branch, vocab_dim), jnp.float32)
    params = init_params(kp, branch=branch, vocab_dim=vocab_dim, batch_size=batch_size)

    out = be_layer_forward(x, params, branch=branch, vocab_dim=vocab_dim,
                           batch_size=batch_size)
    out = jax.block_until_ready(out)
    assert out.shape == (batch_size, 1, branch * vocab_dim)

    ref_mixed = _reference(x, params, branch=branch, vocab_dim=vocab_dim,
                           batch_size=batch_size, bf16_matmul=True)
    assert jnp.allclose(out, ref_mixed, atol=1e-3, rtol=1e-3), \
        "mismatch vs precision-matched reference"
    ref_f32 = _reference(x, params, branch=branch, vocab_dim=vocab_dim,
                         batch_size=batch_size, bf16_matmul=False)
    assert jnp.allclose(out, ref_f32, atol=2e-2, rtol=2e-2), \
        "mismatch vs f32 reference"

    # --- Test 2: exercise the K-tiled (large-vocab) accumulator path. ---
    vocab2 = 256
    kx2, kp2 = jax.random.split(jax.random.PRNGKey(1))
    x2 = jax.random.normal(kx2, (batch_size, branch, vocab2), jnp.float32)
    params2 = init_params(kp2, branch=branch, vocab_dim=vocab2, batch_size=batch_size)
    out2 = be_layer_forward(x2, params2, branch=branch, vocab_dim=vocab2,
                            batch_size=batch_size, n_tile=1, k_tile=128)
    out2 = jax.block_until_ready(out2)
    assert out2.shape == (batch_size, 1, branch * vocab2)
    ref2 = _reference(x2, params2, branch=branch, vocab_dim=vocab2,
                      batch_size=batch_size, bf16_matmul=True)
    assert jnp.allclose(out2, ref2, atol=1e-3, rtol=1e-3), \
        "K-tiled path mismatch vs precision-matched reference"

    print("KERNEL_OK")
</pallas_src>

<mosaic_0001>
module attributes {stable_mosaic.version = 11 : i64} {
  func.func @_be_kernel(%arg0: i32, %arg1: i32, %arg2: memref<2x4x32xf32, #tpu.memory_space<vmem>>, %arg3: memref<2x32x32xbf16, #tpu.memory_space<vmem>>, %arg4: memref<2x4x32xf32, #tpu.memory_space<vmem>>, %arg5: memref<1x32xf32, #tpu.memory_space<vmem>>, %arg6: memref<1x32xf32, #tpu.memory_space<vmem>>, %arg7: memref<1x32xf32, #tpu.memory_space<vmem>>, %arg8: memref<1x32xf32, #tpu.memory_space<vmem>>, %arg9: memref<2x4x32xf32, #tpu.memory_space<vmem>>, %arg10: memref<2x4x32xf32, #tpu.memory_space<vmem>>, %arg11: memref<2x4x32xf32, #tpu.memory_space<vmem>>) attributes {dimension_semantics = [#tpu.dimension_semantics<parallel>, #tpu.dimension_semantics<arbitrary>], iteration_bounds = array<i64: 1, 1>, scalar_prefetch = 0 : i64, scratch_operands = 2 : i64, tpu.core_type = #tpu.core_type<tc>, window_params = [{transform_indices = @transform_0, window_bounds = array<i64: 2, 4, 32>}, {transform_indices = @transform_1, window_bounds = array<i64: 2, 32, 32>}, {transform_indices = @transform_2, window_bounds = array<i64: 2, 4, 32>}, {pipeline_mode = #tpu.pipeline_mode<synchronous>, transform_indices = @transform_3, window_bounds = array<i64: 1, 32>}, {pipeline_mode = #tpu.pipeline_mode<synchronous>, transform_indices = @transform_4, window_bounds = array<i64: 1, 32>}, {pipeline_mode = #tpu.pipeline_mode<synchronous>, transform_indices = @transform_5, window_bounds = array<i64: 1, 32>}, {pipeline_mode = #tpu.pipeline_mode<synchronous>, transform_indices = @transform_6, window_bounds = array<i64: 1, 32>}, {transform_indices = @transform_7, window_bounds = array<i64: 2, 4, 32>}]} {
    %c0_i32 = arith.constant 0 : i32
    %0 = arith.cmpi eq, %arg1, %c0_i32 : i32
    %1 = arith.extui %0 : i1 to i32
    %c0_i32_0 = arith.constant 0 : i32
    %2 = arith.cmpi ne, %1, %c0_i32_0 : i32
    scf.if %2 {
      %c0_14 = arith.constant 0 : index
      %c0_15 = arith.constant 0 : index
      %c0_16 = arith.constant 0 : index
      %13 = vector.load %arg2[%c0_14, %c0_15, %c0_16] : memref<2x4x32xf32, #tpu.memory_space<vmem>>, vector<2x4x32xf32>
      %cst_17 = arith.constant dense<0.000000e+00> : vector<2x4xf32>
      %14 = vector.multi_reduction <add>, %13, %cst_17 [2] : vector<2x4x32xf32> to vector<2x4xf32>
      %15 = vector.shape_cast %14 : vector<2x4xf32> to vector<2x4x1xf32>
      %cst_18 = arith.constant 3.200000e+01 : f32
      %16 = vector.broadcast %cst_18 : f32 to vector<2x4x1xf32>
      %17 = arith.divf %15, %16 : vector<2x4x1xf32>
      %18 = vector.broadcast %17 : vector<2x4x1xf32> to vector<2x4x32xf32>
      %19 = arith.subf %13, %18 : vector<2x4x32xf32>
      %20 = arith.mulf %19, %19 : vector<2x4x32xf32>
      %cst_19 = arith.constant dense<0.000000e+00> : vector<2x4xf32>
      %21 = vector.multi_reduction <add>, %20, %cst_19 [2] : vector<2x4x32xf32> to vector<2x4xf32>
      %22 = vector.shape_cast %21 : vector<2x4xf32> to vector<2x4x1xf32>
      %cst_20 = arith.constant 3.200000e+01 : f32
      %23 = vector.broadcast %cst_20 : f32 to vector<2x4x1xf32>
      %24 = arith.divf %22, %23 : vector<2x4x1xf32>
      %25 = vector.broadcast %17 : vector<2x4x1xf32> to vector<2x4x32xf32>
      %26 = arith.subf %13, %25 : vector<2x4x32xf32>
      %cst_21 = arith.constant 9.99999974E-6 : f32
      %27 = vector.broadcast %cst_21 : f32 to vector<2x4x1xf32>
      %28 = arith.addf %24, %27 : vector<2x4x1xf32>
      %29 = math.rsqrt %28 : vector<2x4x1xf32>
      %30 = vector.broadcast %29 : vector<2x4x1xf32> to vector<2x4x32xf32>
      %31 = arith.mulf %26, %30 : vector<2x4x32xf32>
      %c0_22 = arith.constant 0 : index
      %c0_23 = arith.constant 0 : index
      %32 = vector.load %arg5[%c0_22, %c0_23] : memref<1x32xf32, #tpu.memory_space<vmem>>, vector<1x32xf32>
      %33 = vector.shape_cast %32 : vector<1x32xf32> to vector<1x1x32xf32>
      %34 = vector.broadcast %33 : vector<1x1x32xf32> to vector<2x4x32xf32>
      %35 = arith.mulf %31, %34 : vector<2x4x32xf32>
      %c0_24 = arith.constant 0 : index
      %c0_25 = arith.constant 0 : index
      %36 = vector.load %arg6[%c0_24, %c0_25] : memref<1x32xf32, #tpu.memory_space<vmem>>, vector<1x32xf32>
      %37 = vector.shape_cast %36 : vector<1x32xf32> to vector<1x1x32xf32>
      %38 = vector.broadcast %37 : vector<1x1x32xf32> to vector<2x4x32xf32>
      %39 = arith.addf %35, %38 : vector<2x4x32xf32>
      %c0_26 = arith.constant 0 : index
      %c0_27 = arith.constant 0 : index
      %c0_28 = arith.constant 0 : index
      %40 = vector.load %arg11[%c0_26, %c0_27, %c0_28] : memref<2x4x32xf32, #tpu.memory_space<vmem>>, vector<2x4x32xf32>
      tpu.vector_store %arg11[%c0_26, %c0_27, %c0_28], %39 {strides = array<i32>} : memref<2x4x32xf32, #tpu.memory_space<vmem>>, vector<2x4x32xf32>,
      %cst_29 = arith.constant 0.000000e+00 : f32
      %41 = vector.broadcast %cst_29 : f32 to vector<2x4x32xf32>
      %c0_30 = arith.constant 0 : index
      %c0_31 = arith.constant 0 : index
      %c0_32 = arith.constant 0 : index
      %42 = vector.load %arg10[%c0_30, %c0_31, %c0_32] : memref<2x4x32xf32, #tpu.memory_space<vmem>>, vector<2x4x32xf32>
      tpu.vector_store %arg10[%c0_30, %c0_31, %c0_32], %41 {strides = array<i32>} : memref<2x4x32xf32, #tpu.memory_space<vmem>>, vector<2x4x32xf32>,
    } else {
    }
    %c0 = arith.constant 0 : index
    %c0_1 = arith.constant 0 : index
    %c0_2 = arith.constant 0 : index
    %3 = vector.load %arg3[%c0, %c0_1, %c0_2] : memref<2x32x32xbf16, #tpu.memory_space<vmem>>, vector<2x32x32xbf16>
    %c0_3 = arith.constant 0 : index
    %c0_4 = arith.constant 0 : index
    %c0_5 = arith.constant 0 : index
    %4 = vector.load %arg11[%c0_3, %c0_4, %c0_5] : memref<2x4x32xf32, #tpu.memory_space<vmem>>, vector<2x4x32xf32>
    %c0_6 = arith.constant 0 : index
    %c0_7 = arith.constant 0 : index
    %c0_8 = arith.constant 0 : index
    %5 = vector.load %arg10[%c0_6, %c0_7, %c0_8] : memref<2x4x32xf32, #tpu.memory_space<vmem>>, vector<2x4x32xf32>
    %6 = arith.truncf %4 : vector<2x4x32xf32> to vector<2x4x32xbf16>
    "tpu.trace_start"() <{level = 10 : i32, message = "nbk,nke->nbe"}> : () -> ()
    %cst = arith.constant dense<0.000000e+00> : vector<2x4x32xf32>
    %7 = tpu.matmul %6, %3, %cst {dimension_numbers = #tpu.dot_dimension_numbers<[2], [1], [1], [2], [0, 0, 0, 1, 1, 2], [0], [0]>} : vector<2x4x32xbf16>, vector<2x32x32xbf16>, vector<2x4x32xf32> -> vector<2x4x32xf32>
    "tpu.trace_stop"() : () -> ()
    %8 = arith.addf %5, %7 : vector<2x4x32xf32>
    %c0_9 = arith.constant 0 : index
    %c0_10 = arith.constant 0 : index
    %c0_11 = arith.constant 0 : index
    %9 = vector.load %arg10[%c0_9, %c0_10, %c0_11] : memref<2x4x32xf32, #tpu.memory_space<vmem>>, vector<2x4x32xf32>
    tpu.vector_store %arg10[%c0_9, %c0_10, %c0_11], %8 {strides = array<i32>} : memref<2x4x32xf32, #tpu.memory_space<vmem>>, vector<2x4x32xf32>,
    %c0_i32_12 = arith.constant 0 : i32
    %10 = arith.cmpi eq, %arg1, %c0_i32_12 : i32
    %11 = arith.extui %10 : i1 to i32
    %c0_i32_13 = arith.constant 0 : i32
    %12 = arith.cmpi ne, %11, %c0_i32_13 : i32
    scf.if %12 {
      %c0_14 = arith.constant 0 : index
      %c0_15 = arith.constant 0 : index
      %c0_16 = arith.constant 0 : index
      %13 = vector.load %arg10[%c0_14, %c0_15, %c0_16] : memref<2x4x32xf32, #tpu.memory_space<vmem>>, vector<2x4x32xf32>
      %c0_17 = arith.constant 0 : index
      %c0_18 = arith.constant 0 : index
      %c0_19 = arith.constant 0 : index
      %14 = vector.load %arg4[%c0_17, %c0_18, %c0_19] : memref<2x4x32xf32, #tpu.memory_space<vmem>>, vector<2x4x32xf32>
      %15 = arith.addf %13, %14 : vector<2x4x32xf32>
      %cst_20 = arith.constant dense<0.000000e+00> : vector<2x4xf32>
      %16 = vector.multi_reduction <add>, %15, %cst_20 [2] : vector<2x4x32xf32> to vector<2x4xf32>
      %17 = vector.shape_cast %16 : vector<2x4xf32> to vector<2x4x1xf32>
      %cst_21 = arith.constant 3.200000e+01 : f32
      %18 = vector.broadcast %cst_21 : f32 to vector<2x4x1xf32>
      %19 = arith.divf %17, %18 : vector<2x4x1xf32>
      %20 = vector.broadcast %19 : vector<2x4x1xf32> to vector<2x4x32xf32>
      %21 = arith.subf %15, %20 : vector<2x4x32xf32>
      %22 = arith.mulf %21, %21 : vector<2x4x32xf32>
      %cst_22 = arith.constant dense<0.000000e+00> : vector<2x4xf32>
      %23 = vector.multi_reduction <add>, %22, %cst_22 [2] : vector<2x4x32xf32> to vector<2x4xf32>
      %24 = vector.shape_cast %23 : vector<2x4xf32> to vector<2x4x1xf32>
      %cst_23 = arith.constant 3.200000e+01 : f32
      %25 = vector.broadcast %cst_23 : f32 to vector<2x4x1xf32>
      %26 = arith.divf %24, %25 : vector<2x4x1xf32>
      %27 = vector.broadcast %19 : vector<2x4x1xf32> to vector<2x4x32xf32>
      %28 = arith.subf %15, %27 : vector<2x4x32xf32>
      %cst_24 = arith.constant 9.99999974E-6 : f32
      %29 = vector.broadcast %cst_24 : f32 to vector<2x4x1xf32>
      %30 = arith.addf %26, %29 : vector<2x4x1xf32>
      %31 = math.rsqrt %30 : vector<2x4x1xf32>
      %32 = vector.broadcast %31 : vector<2x4x1xf32> to vector<2x4x32xf32>
      %33 = arith.mulf %28, %32 : vector<2x4x32xf32>
      %c0_25 = arith.constant 0 : index
      %c0_26 = arith.constant 0 : index
      %34 = vector.load %arg7[%c0_25, %c0_26] : memref<1x32xf32, #tpu.memory_space<vmem>>, vector<1x32xf32>
      %35 = vector.shape_cast %34 : vector<1x32xf32> to vector<1x1x32xf32>
      %36 = vector.broadcast %35 : vector<1x1x32xf32> to vector<2x4x32xf32>
      %37 = arith.mulf %33, %36 : vector<2x4x32xf32>
      %c0_27 = arith.constant 0 : index
      %c0_28 = arith.constant 0 : index
      %38 = vector.load %arg8[%c0_27, %c0_28] : memref<1x32xf32, #tpu.memory_space<vmem>>, vector<1x32xf32>
      %39 = vector.shape_cast %38 : vector<1x32xf32> to vector<1x1x32xf32>
      %40 = vector.broadcast %39 : vector<1x1x32xf32> to vector<2x4x32xf32>
      %41 = arith.addf %37, %40 : vector<2x4x32xf32>
      %cst_29 = arith.constant 5.000000e-01 : f32
      %42 = vector.broadcast %cst_29 : f32 to vector<2x4x32xf32>
      %43 = arith.mulf %42, %41 : vector<2x4x32xf32>
      %cst_30 = arith.constant 0.707106769 : f32
      %44 = vector.broadcast %cst_30 : f32 to vector<2x4x32xf32>
      %45 = arith.mulf %41, %44 : vector<2x4x32xf32>
      %46 = math.erf %45 : vector<2x4x32xf32>
      %cst_31 = arith.constant 1.000000e+00 : f32
      %47 = vector.broadcast %cst_31 : f32 to vector<2x4x32xf32>
      %48 = arith.addf %47, %46 : vector<2x4x32xf32>
      %49 = arith.mulf %43, %48 : vector<2x4x32xf32>
      %c0_32 = arith.constant 0 : index
      %c0_33 = arith.constant 0 : index
      %c0_34 = arith.constant 0 : index
      %50 = vector.load %arg11[%c0_32, %c0_33, %c0_34] : memref<2x4x32xf32, #tpu.memory_space<vmem>>, vector<2x4x32xf32>
      %51 = arith.addf %50, %49 : vector<2x4x32xf32>
      %cst_35 = arith.constant 5.000000e-01 : f32
      %52 = vector.broadcast %cst_35 : f32 to vector<2x4x32xf32>
      %53 = arith.mulf %51, %52 : vector<2x4x32xf32>
      %c0_36 = arith.constant 0 : index
      %c0_37 = arith.constant 0 : index
      %c0_38 = arith.constant 0 : index
      %54 = vector.load %arg9[%c0_36, %c0_37, %c0_38] : memref<2x4x32xf32, #tpu.memory_space<vmem>>, vector<2x4x32xf32>
      tpu.vector_store %arg9[%c0_36, %c0_37, %c0_38], %53 {strides = array<i32>} : memref<2x4x32xf32, #tpu.memory_space<vmem>>, vector<2x4x32xf32>,
    } else {
    }
    return
  }
  func.func @transform_0(%arg0: i32, %arg1: i32) -> (i32, i32, i32) {
    %c0_i32 = arith.constant 0 : i32
    %c0_i32_0 = arith.constant 0 : i32
    %c0_i32_1 = arith.constant 0 : i32
    return %arg0, %c0_i32, %c0_i32_0 : i32, i32, i32
  }
  func.func @transform_1(%arg0: i32, %arg1: i32) -> (i32, i32, i32) {
    %c0_i32 = arith.constant 0 : i32
    %c0_i32_0 = arith.constant 0 : i32
    return %arg0, %arg1, %c0_i32 : i32, i32, i32
  }
  func.func @transform_2(%arg0: i32, %arg1: i32) -> (i32, i32, i32) {
    %c0_i32 = arith.constant 0 : i32
    %c0_i32_0 = arith.constant 0 : i32
    %c0_i32_1 = arith.constant 0 : i32
    return %arg0, %c0_i32, %c0_i32_0 : i32, i32, i32
  }
  func.func @transform_3(%arg0: i32, %arg1: i32) -> (i32, i32) {
    %c0_i32 = arith.constant 0 : i32
    %c0_i32_0 = arith.constant 0 : i32
    %c0_i32_1 = arith.constant 0 : i32
    return %c0_i32, %c0_i32_0 : i32, i32
  }
  func.func @transform_4(%arg0: i32, %arg1: i32) -> (i32, i32) {
    %c0_i32 = arith.constant 0 : i32
    %c0_i32_0 = arith.constant 0 : i32
    %c0_i32_1 = arith.constant 0 : i32
    return %c0_i32, %c0_i32_0 : i32, i32
  }
  func.func @transform_5(%arg0: i32, %arg1: i32) -> (i32, i32) {
    %c0_i32 = arith.constant 0 : i32
    %c0_i32_0 = arith.constant 0 : i32
    %c0_i32_1 = arith.constant 0 : i32
    return %c0_i32, %c0_i32_0 : i32, i32
  }
  func.func @transform_6(%arg0: i32, %arg1: i32) -> (i32, i32) {
    %c0_i32 = arith.constant 0 : i32
    %c0_i32_0 = arith.constant 0 : i32
    %c0_i32_1 = arith.constant 0 : i32
    return %c0_i32, %c0_i32_0 : i32, i32
  }
  func.func @transform_7(%arg0: i32, %arg1: i32) -> (i32, i32, i32) {
    %c0_i32 = arith.constant 0 : i32
    %c0_i32_0 = arith.constant 0 : i32
    %c0_i32_1 = arith.constant 0 : i32
    return %arg0, %c0_i32, %c0_i32_0 : i32, i32, i32
  }
}

</mosaic_0001>

<bundles_post_ra>
// kernel: tpu_custom_call.1
= control target key start
LH: loop header
LB: loop body
LE: loop exit
PB: predicated region body
PF: predicated region fallthrough
CT: control target
= control target key end

     0   :  { %12 = vsyncpa [#allocation5], 0  ;;  %s638_s0 = inlined_call_operand.hbm [shape: f32[2,4,32], index: 0, kind: input, shape index: {}]   ;;  %s639_s1 = inlined_call_operand.hbm [shape: bf16[2,32,32], index: 1, kind: input, shape index: {}]   ;;  %s640_s2 = inlined_call_operand.hbm [shape: f32[2,4,32], index: 2, kind: input, shape index: {}]   ;;  %s641_s3 = inlined_call_operand.vmem [shape: f32[1,32], index: 3, kind: input, shape index: {}]   ;;  %s642_s4 = inlined_call_operand.vmem [shape: f32[1,32], index: 4, kind: input, shape index: {}]   ;;  %s643_s5 = inlined_call_operand.vmem [shape: f32[1,32], index: 5, kind: input, shape index: {}]   ;;  %s644_s6 = inlined_call_operand.vmem [shape: f32[1,32], index: 6, kind: input, shape index: {}]   ;;  %s645_s7 = inlined_call_operand.hbm [shape: f32[2,4,32], index: 7, kind: output, shape index: {}]  }
   0x1   :  { %13 = vsyncpa [#allocation8], 0 }
   0x2   :  { %14 = vsyncpa [#allocation6], 0  ;;  %s495_s24 = smov [#allocation7]   ;;  %s496_s26 = smov [#allocation4]  }
   0x3   :  { %s32_s25 = sshll.u32 %s495_s24, 4  ;;  %s20_s27 = sshll.u32 %s496_s26, 4  ;;  %s33_s25 = int_to_ptr.vmem [resolvable:$true] %s32_s25  ;;  %s543_s27 = int_to_ptr.vmem [resolvable:$true] %s20_s27 }
   0x4   :  { %s401_s30 = scalar_lea.hbm %s639_s1, 512 }
   0x5   :  { %p402_p0 = scmp.ne.s32.totalorder %s639_s1, %s401_s30  ;;  %p405_p1 = scmp.lt.u32.totalorder %s401_s30, %s639_s1 }
   0x7   :  { %p407_p2 = pnand %p405_p1, %p402_p0 }
   0x9   :  { %410 = shalt.err (!%p407_p2)
}
   0xa   :  { %s411_s12 = scalar_lea.vmem %s33_s25, 512  ;;  %p416_p4 = scmp.lt.s32.totalorder %s33_s25, %s33_s25 }
   0xb   :  { %p412_p3 = scmp.ne.s32.totalorder %s33_s25, %s411_s12  ;;  %p417_p5 = scmp.lt.s32.totalorder %s411_s12, %s411_s12 }
   0xd   :  { %p418_p6 = por %p417_p5, %p416_p4 }
   0xf   :  { %p419_p7 = pnand %p418_p6, %p412_p3 }
  0x11   :  { %422 = shalt.err (!%p419_p7)
}
  0x12   :  { %s497_s13 = smov 64   ;;  %s498_s14 = smov 4  }
  0x13   :  { %38 = dma.hbm_to_vmem [thread:$0]  %s639_s1, 512, %s33_s25, [#allocation8], %s497_s13, %s497_s13, %s498_s14  }
  0x14   :  { %s423_s19 = scalar_lea.hbm %s638_s0, 128 }
  0x15   :  { %p424_p8 = scmp.ne.s32.totalorder %s638_s0, %s423_s19  ;;  %p427_p9 = scmp.lt.u32.totalorder %s423_s19, %s638_s0 }
  0x17   :  { %p429_p10 = pnand %p427_p9, %p424_p8 }
  0x19   :  { %432 = shalt.err (!%p429_p10)
}
  0x1a   :  { %s433_s24 = scalar_lea.vmem %s543_s27, 128  ;;  %p438_p12 = scmp.lt.s32.totalorder %s543_s27, %s543_s27 }
  0x1b   :  { %p434_p11 = scmp.ne.s32.totalorder %s543_s27, %s433_s24  ;;  %p439_p13 = scmp.lt.s32.totalorder %s433_s24, %s433_s24 }
  0x1d   :  { %p440_p0 = por %p439_p13, %p438_p12 }
  0x1f   :  { %p441_p1 = pnand %p440_p0, %p434_p11 }
  0x21   :  { %444 = shalt.err (!%p441_p1)
}
  0x22   :  { %26 = dma.hbm_to_vmem [thread:$0]  %s638_s0, 128, %s543_s27, [#allocation5], %s497_s13, %s497_s13, %s498_s14  }
  0x23   :  { %s499_s26 = smov [#allocation9]   ;;  %s445_s8 = scalar_lea.hbm %s640_s2, 128 }
  0x24   :  { %s44_s28 = sshll.u32 %s499_s26, 4  ;;  %p446_p2 = scmp.ne.s32.totalorder %s640_s2, %s445_s8  ;;  %s45_s28 = int_to_ptr.vmem [resolvable:$true] %s44_s28 }
  0x25   :  { %p449_p3 = scmp.lt.u32.totalorder %s445_s8, %s640_s2 }
  0x27   :  { %p451_p4 = pnand %p449_p3, %p446_p2 }
  0x29   :  { %454 = shalt.err (!%p451_p4)
}
  0x2a   :  { %s455_s15 = scalar_lea.vmem %s45_s28, 128  ;;  %p460_p6 = scmp.lt.s32.totalorder %s45_s28, %s45_s28 }
  0x2b   :  { %p456_p5 = scmp.ne.s32.totalorder %s45_s28, %s455_s15  ;;  %p461_p7 = scmp.lt.s32.totalorder %s455_s15, %s455_s15 }
  0x2d   :  { %p462_p8 = por %p461_p7, %p460_p6 }
  0x2f   :  { %p463_p9 = pnand %p462_p8, %p456_p5 }
  0x31   :  { %466 = shalt.err (!%p463_p9)
}
  0x32   :  { %50 = dma.hbm_to_vmem [thread:$0]  %s640_s2, 128, %s45_s28, [#allocation8], %s497_s13, %s497_s13, %s498_s14  }
  0x33   :  { %489 = dma.done.wait [#allocation5], 128  }
  0x34   :  { %490 = vsyncadd [#allocation5], 4294967168 }
  0x35   :  { %491 = dma.done.wait [#allocation8], 640  }
  0x36   :  { %492 = vsyncadd [#allocation8], 4294966656  ;;  %vm75_vm0 = vcmask 257024   ;;  %v73_v0 = vld [vmem:[#allocation4] sm:$0xf]  ;;  %v385_v14 = vld [vmem:[#allocation7] sm:$0xff]  }
  0x37   :  { %v74_v1 = vld [vmem:[#allocation4 + $0x4] sm:$0xf]  ;;  %v76_v2 = vsel %vm75_vm0, %v73_v0, 0.0  ;;  %v500_v15 = vmov 0.0   ;;  %v386_v16 = vld [vmem:[#allocation7 + $0x8] sm:$0xff]   ;;  %v387_v17 = vld [vmem:[#allocation7 + $0x10] sm:$0xff]  }
  0x38   :  { %77 = vadd.xlane.f32.xlu0 %v76_v2  ;;  %v79_v3 = vsel %vm75_vm0, %v74_v1, 0.0  ;;  %361 = vmatprep.subr.bf16.mxu0 %v500_v15  ;;  %123 = vst.msk [vmem:[#allocation2] sm:$0xf] %vm75_vm0, %v500_v15  ;;  %124 = vst.msk [vmem:[#allocation2 + $0x4] sm:$0xf] %vm75_vm0, %v500_v15  ;;  %vm501_vm1 = vmmov 0  }
  0x39   :  { %369 = vmatprep.subr.bf16.mxu1 %v500_v15  ;;  %362 = vmatpush3.bf16.msra.mxu0 %v385_v14  ;;  %v388_v18 = vld [vmem:[#allocation7 + $0x18] sm:$0xff]   ;;  %v345_v26 = vld [vmem:[%s641_s3] ss:$0 sm:$0xff]  ;;  %vm151_vm2 = vcmask 261120   ;;  %v260_v51 = vld [vmem:[#allocation9] sm:$0xf] }
  0x3a   :  { %363 = vmatprep.subr.bf16.mxu0 %v500_v15  ;;  %365 = vmatprep.mubr.msk.bf16.mxu0 %vm501_vm1, %v500_v15  ;;  %v346_v28 = vld [vmem:[%s642_s4] ss:$0 sm:$0xff]  ;;  %v261_v54 = vld [vmem:[#allocation9 + $0x4] sm:$0xf] }
  0x3b   :  { %373 = vmatprep.mubr.msk.bf16.mxu1 %vm501_vm1, %v500_v15  ;;  %370 = vmatpush3.bf16.msra.mxu1 %v387_v17  ;;  %v354_v14 = vld [vmem:[%s644_s6] ss:$0 sm:$0xff] }
  0x3c   :  { %80 = vadd.xlane.f32.xlu0 %v79_v3  ;;  %371 = vmatprep.subr.bf16.mxu1 %v500_v15 }
  0x3d   :  { %364 = vmatpush3.bf16.msra.mxu0 %v386_v16 }
  0x3f   :  { %372 = vmatpush3.bf16.msra.mxu1 %v388_v18  ;;  %v135_v39 = vld [vmem:[#allocation2] sm:$0xf]  ;;  %v136_v44 = vld [vmem:[#allocation2 + $0x4] sm:$0xf] }
  0xc5   :  { %v78_v4 = vpop.xlane.xlu0 %77 }
  0xc6   :  { %v83_v5 = vmul.f32 0.03125, %v78_v4 }
  0xc8   :  { %v85_v6 = vsub.f32 %v73_v0, %v83_v5 }
  0xc9   :  { %v81_v7 = vpop.xlane.xlu0 %80 }
  0xca   :  { %v84_v8 = vmul.f32 0.03125, %v81_v7  ;;  %v87_v9 = vmul.f32 %v85_v6, %v85_v6 }
  0xcc   :  { %v86_v10 = vsub.f32 %v74_v1, %v84_v8  ;;  %v89_v11 = vsel %vm75_vm0, %v87_v9, 0.0 }
  0xcd   :  { %90 = vadd.xlane.f32.xlu1 %v89_v11 }
  0xce   :  { %v88_v12 = vmul.f32 %v86_v10, %v86_v10 }
  0xd0   :  { %v92_v13 = vsel %vm75_vm0, %v88_v12, 0.0  ;;  %v353_v12 = vld [vmem:[%s643_s5] ss:$0 sm:$0xff]  ;;  %s502_s5 = smov [#allocation10]  }
  0xd1   :  { %93 = vadd.xlane.f32.xlu1 %v92_v13  ;;  %s332_s6 = sshll.u32 %s502_s5, 4  ;;  %s333_s6 = int_to_ptr.vmem [resolvable:$true] %s332_s6 }
  0xd2   :  { %s467_s21 = scalar_lea.vmem %s333_s6, 128  ;;  %p472_p11 = scmp.lt.s32.totalorder %s333_s6, %s333_s6 }
  0xd3   :  { %p468_p10 = scmp.ne.s32.totalorder %s333_s6, %s467_s21  ;;  %p473_p12 = scmp.lt.s32.totalorder %s467_s21, %s467_s21 }
  0xd5   :  { %p474_p13 = por %p473_p12, %p472_p11 }
  0xd7   :  { %p475_p0 = pnand %p474_p13, %p468_p10 }
 0x15a   :  { %v91_v19 = vpop.xlane.xlu1 %90 }
 0x15b   :  { %v95_v20 = vmul.f32 0.03125, %v91_v19 }
 0x15d   :  { %v97_v21 = vadd.f32 1e-05, %v95_v20 }
 0x15e   :  { %v94_v22 = vpop.xlane.xlu1 %93 }
 0x15f   :  { %389 = vrsqrt.f32 %v97_v21  ;;  %v96_v23 = vmul.f32 0.03125, %v94_v22 }
 0x161   :  { %v98_v24 = vadd.f32 1e-05, %v96_v23 }
 0x163   :  { %391 = vrsqrt.f32 %v98_v24 }
 0x169   :  { %v390_v25 = vpop.eup %389 }
 0x16a   :  { %v101_v27 = vmul.f32 %v390_v25, %v85_v6 }
 0x16c   :  { %v110_v29 = vmul.f32 %v345_v26, %v101_v27 }
 0x16d   :  { %v392_v30 = vpop.eup %391 }
 0x16e   :  { %v119_v31 = vadd.f32 %v346_v28, %v110_v29  ;;  %v102_v32 = vmul.f32 %v392_v30, %v86_v10 }
 0x170   :  { %121 = vst.msk [vmem:[#allocation3] sm:$0xf] %vm75_vm0, %v119_v31  ;;  %v111_v33 = vmul.f32 %v345_v26, %v102_v32 }
 0x172   :  { %v120_v34 = vadd.f32 %v346_v28, %v111_v33 }
 0x174   :  { %122 = vst.msk [vmem:[#allocation3 + $0x4] sm:$0xf] %vm75_vm0, %v120_v34 }
 0x177   :  { %v133_v35 = vld [vmem:[#allocation3] sm:$0xf] }
 0x178   :  { %v137_v36 = vpack.c.bf16 %v133_v35, %v133_v35  ;;  %v319_v28 = vld [vmem:[#allocation3] sm:$0xf] }
 0x17a   :  { %366 = vmatmul.mubr.msk.bf16.vlgmr.msra.gmra.mrb[0].mxu0 %vm151_vm2, %v137_v36 }
 0x17b   :  { %v134_v37 = vld [vmem:[#allocation3 + $0x4] sm:$0xf] }
 0x17c   :  { %v138_v38 = vpack.c.bf16 %v134_v37, %v134_v37  ;;  %v320_v34 = vld [vmem:[#allocation3 + $0x4] sm:$0xf] }
 0x17e   :  { %374 = vmatmul.mubr.msk.bf16.vlgmr.msra.gmra.mrb[0].mxu1 %vm151_vm2, %v138_v38 }
 0x24d   :  { %v189_v40 = vpop.f32.mrb[0].mxu0 }
 0x24e   :  { %v250_v41 = vadd.f32 %v189_v40, %v135_v39  ;;  %v367_v42 = vpop.f32.mrb[1].mxu0 }
 0x24f   :  { %v192_v43 = vpop.f32.mrb[2].mxu0 }
 0x250   :  { %253 = vst.msk [vmem:[#allocation2] sm:$0xf] %vm75_vm0, %v250_v41  ;;  %v368_v45 = vpop.f32.mrb[3].mxu0 }
 0x251   :  { %v244_v46 = vpop.f32.mrb[0].mxu1 }
 0x252   :  { %v251_v47 = vadd.f32 %v244_v46, %v136_v44  ;;  %v375_v48 = vpop.f32.mrb[1].mxu1 }
 0x253   :  { %v247_v49 = vpop.f32.mrb[2].mxu1 }
 0x254   :  { %254 = vst.msk [vmem:[#allocation2 + $0x4] sm:$0xf] %vm75_vm0, %v251_v47  ;;  %v376_v50 = vpop.f32.mrb[3].mxu1 }
 0x257   :  { %v258_v52 = vld [vmem:[#allocation2] sm:$0xf] }
 0x258   :  { %v262_v53 = vadd.f32 %v260_v51, %v258_v52 }
 0x25a   :  { %v264_v55 = vsel %vm75_vm0, %v262_v53, 0.0 }
 0x25b   :  { %265 = vadd.xlane.f32.xlu0 %v264_v55  ;;  %v259_v56 = vld [vmem:[#allocation2 + $0x4] sm:$0xf] }
 0x25c   :  { %v263_v57 = vadd.f32 %v261_v54, %v259_v56 }
 0x25e   :  { %v267_v58 = vsel %vm75_vm0, %v263_v57, 0.0 }
 0x25f   :  { %268 = vadd.xlane.f32.xlu1 %v267_v58 }
 0x2e8   :  { %v266_v59 = vpop.xlane.xlu0 %265 }
 0x2e9   :  { %v271_v60 = vmul.f32 0.03125, %v266_v59 }
 0x2eb   :  { %v273_v61 = vsub.f32 %v262_v53, %v271_v60 }
 0x2ec   :  { %v269_v62 = vpop.xlane.xlu1 %268 }
 0x2ed   :  { %v272_v63 = vmul.f32 0.03125, %v269_v62  ;;  %v275_v0 = vmul.f32 %v273_v61, %v273_v61 }
 0x2ef   :  { %v274_v1 = vsub.f32 %v263_v57, %v272_v63  ;;  %v277_v2 = vsel %vm75_vm0, %v275_v0, 0.0 }
 0x2f0   :  { %278 = vadd.xlane.f32.xlu0 %v277_v2 }
 0x2f1   :  { %v276_v3 = vmul.f32 %v274_v1, %v274_v1 }
 0x2f3   :  { %v280_v4 = vsel %vm75_vm0, %v276_v3, 0.0 }
 0x2f4   :  { %281 = vadd.xlane.f32.xlu1 %v280_v4 }
 0x37d   :  { %v279_v5 = vpop.xlane.xlu0 %278 }
 0x37e   :  { %v283_v6 = vmul.f32 0.03125, %v279_v5 }
 0x380   :  { %v285_v7 = vadd.f32 1e-05, %v283_v6 }
 0x381   :  { %v282_v8 = vpop.xlane.xlu1 %281 }
 0x382   :  { %393 = vrsqrt.f32 %v285_v7  ;;  %v284_v9 = vmul.f32 0.03125, %v282_v8 }
 0x384   :  { %v286_v10 = vadd.f32 1e-05, %v284_v9 }
 0x386   :  { %395 = vrsqrt.f32 %v286_v10 }
 0x38c   :  { %v394_v11 = vpop.eup %393 }
 0x38d   :  { %v289_v13 = vmul.f32 %v394_v11, %v273_v61 }
 0x38f   :  { %v298_v15 = vmul.f32 %v353_v12, %v289_v13 }
 0x390   :  { %v396_v16 = vpop.eup %395 }
 0x391   :  { %v290_v17 = vmul.f32 %v396_v16, %v274_v1  ;;  %v307_v18 = vadd.f32 %v354_v14, %v298_v15 }
 0x393   :  { %v299_v19 = vmul.f32 %v353_v12, %v290_v17  ;;  %v311_v20 = vmul.f32 0.70710677, %v307_v18  ;;  %v309_v24 = vmul.f32 0.5, %v307_v18 }
 0x395   :  { %v308_v21 = vadd.f32 %v354_v14, %v299_v19  ;;  %397 = verf.f32 %v311_v20 }
 0x397   :  { %v312_v22 = vmul.f32 0.70710677, %v308_v21  ;;  %v310_v29 = vmul.f32 0.5, %v308_v21 }
 0x399   :  { %399 = verf.f32 %v312_v22 }
 0x39f   :  { %v398_v23 = vpop.eup %397 }
 0x3a0   :  { %v315_v25 = vadd.f32 1.0, %v398_v23 }
 0x3a2   :  { %v317_v26 = vmul.f32 %v315_v25, %v309_v24 }
 0x3a3   :  { %v400_v27 = vpop.eup %399 }
 0x3a4   :  { %v316_v30 = vadd.f32 1.0, %v400_v27  ;;  %v321_v31 = vadd.f32 %v319_v28, %v317_v26 }
 0x3a6   :  { %v318_v32 = vmul.f32 %v316_v30, %v310_v29  ;;  %v323_v33 = vmul.f32 0.5, %v321_v31 }
 0x3a8   :  { %v322_v35 = vadd.f32 %v320_v34, %v318_v32  ;;  %325 = vst.msk [vmem:[#allocation10] sm:$0xf] %vm75_vm0, %v323_v33 }
 0x3aa   :  { %v324_v36 = vmul.f32 0.5, %v322_v35 }
 0x3ac   :  { %326 = vst.msk [vmem:[#allocation10 + $0x4] sm:$0xf] %vm75_vm0, %v324_v36 }
 0x3ad   :  { %478 = shalt.err (!%p475_p0)
}
 0x3ae   :  { %s479_s24 = scalar_lea.hbm %s645_s7, 128 }
 0x3af   :  { %p480_p1 = scmp.ne.s32.totalorder %s645_s7, %s479_s24  ;;  %p483_p2 = scmp.lt.u32.totalorder %s479_s24, %s645_s7 }
 0x3b1   :  { %p485_p3 = pnand %p483_p2, %p480_p1 }
 0x3b3   :  { %488 = shalt.err (!%p485_p3)
}
 0x3b4   :  { %338 = dma.vmem_to_hbm [thread:$0]  %s333_s6, 128, %s645_s7, [#allocation6], %s497_s13, %s497_s13, %s498_s14  }
 0x3b5   :  { %493 = dma.done.wait [#allocation6], 128  }
 0x3b6   :  { %494 = vsyncadd [#allocation6], 4294967168 }
 0x3b7   :  { %342 = vsyncpa [#allocation5], 1 }
 0x3b8   :  { %343 = vsyncpa [#allocation8], 1 }
 0x3b9   :  { %344 = vsyncpa [#allocation6], 1 }

</bundles_post_ra>
